<compile_context>
chip_gen: v6e
topology: v6e:2x2x1
jax: 0.10.0
libtpu: 0.0.40
codegen_flags: <defaults>
</compile_context>

<pallas_src>
import functools
import math

import jax
import jax.numpy as jnp
from jax.experimental import pallas as pl
from jax.experimental.pallas import tpu as pltpu

_MIB = 1024 * 1024


def _round_up(x, m):
    return ((x + m - 1) // m) * m


def _sublane_multiple(dtype):
    itemsize = jnp.dtype(dtype).itemsize
    return {4: 8, 2: 16, 1: 32}.get(itemsize, 8)


@functools.lru_cache(maxsize=None)
def _chip_config():
    """Returns (tile_budget_bytes, vmem_limit_cap_bytes, num_tensorcores)."""
    # Conservative fallback if the hardware query is unavailable.
    tile_budget, vmem_cap, num_tc = 10 * _MIB, 48 * _MIB, 1
    try:
        info = pltpu.get_tpu_info()
    except Exception:
        return tile_budget, vmem_cap, num_tc
    cap = 0
    for name in ("vmem_capacity_bytes", "vmem_size_bytes", "vmem_bytes"):
        val = getattr(info, name, None)
        if val:
            cap = int(val)
            break
    if cap >= 100 * _MIB:
        # v5e / v6e class: 128 MiB VMEM, single TensorCore -> large streaming tiles.
        return 36 * _MIB, 96 * _MIB, 1
    if cap > 0:
        # v7x class: 64 MiB per TC, 2 TCs -> smaller tiles, headroom for the
        # in-kernel f32 working set, and >= 2 grid steps along parallel axes.
        return 10 * _MIB, min(cap - 8 * _MIB, 56 * _MIB), 2
    return tile_budget, vmem_cap, num_tc


def _vmem_limit(working_bytes, cap):
    return int(min(max(int(working_bytes) + 4 * _MIB, 32 * _MIB), cap))


# --------------------------------------------------------------------------
# channels_last kernels: normalize over the last (lane) axis.
# --------------------------------------------------------------------------
def _ln_lastdim_packed_kernel(x_ref, w_ref, b_ref, seg_ref, segt_ref, o_ref,
                              *, eps, inv_c):
    # k logical rows are packed along lanes; per-row stats are segmented
    # reductions done on the otherwise-idle MXU via 0/1 segment matrices.
    x_in = x_ref[...]                                              # (rows, k*C), native dtype
    x = x_in.astype(jnp.float32)
    seg = seg_ref[...]                                             # (k*C, k)
    segt = segt_ref[...]                                           # (k, k*C)
    s1 = jnp.dot(x_in, seg, preferred_element_type=jnp.float32)    # (rows, k)
    s2 = jnp.dot(x * x, seg, preferred_element_type=jnp.float32)   # f32 for variance precision
    mu = s1 * inv_c
    var = s2 * inv_c - mu * mu
    inv = jax.lax.rsqrt(var + eps)
    mu_l = jnp.dot(mu, segt, preferred_element_type=jnp.float32)   # broadcast back to lanes
    inv_l = jnp.dot(inv, segt, preferred_element_type=jnp.float32)
    w = w_ref[...].astype(jnp.float32)
    b = b_ref[...].astype(jnp.float32)
    o_ref[...] = ((x - mu_l) * inv_l * w + b).astype(o_ref.dtype)


def _ln_rows_kernel(x_ref, w_ref, b_ref, o_ref, *, eps, inv_c):
    # C is already a multiple of 128: plain lane reduction per row.
    x = x_ref[...].astype(jnp.float32)                             # (rows, C)
    mu = jnp.sum(x, axis=-1, keepdims=True) * inv_c
    var = jnp.sum(x * x, axis=-1, keepdims=True) * inv_c - mu * mu
    inv = jax.lax.rsqrt(var + eps)
    w = w_ref[...].astype(jnp.float32)
    b = b_ref[...].astype(jnp.float32)
    o_ref[...] = ((x - mu) * inv * w + b).astype(o_ref.dtype)


def _layer_norm_lastdim(x2d, weight, bias, eps):
    R, C = x2d.shape
    dtype = x2d.dtype
    itemsize = jnp.dtype(dtype).itemsize
    sub = _sublane_multiple(dtype)
    tile_budget, vmem_cap, num_tc = _chip_config()

    # Lane packing: k logical rows per slab row so the lane dim is a multiple
    # of 128.  If R % k != 0 we pad a few (<k) dummy rows rather than falling
    # back to a lane-masked layout.
    k = 128 // math.gcd(C, 128)
    R_pad = _round_up(R, k)
    xp = x2d if R_pad == R else jnp.pad(x2d, ((0, R_pad - R), (0, 0)))
    Cp = k * C
    Rp = R_pad // k
    x_slab = xp.reshape(Rp, Cp)

    if k > 1:
        # 0/1 segment matrices are exact in bf16; use bf16 when data is
        # sub-32-bit so the stats matmuls take the fast MXU path.
        param_dtype = jnp.bfloat16 if itemsize < 4 else jnp.float32
        lane = jnp.arange(Cp, dtype=jnp.int32)
        seg = (lane[:, None] // C
               == jnp.arange(k, dtype=jnp.int32)[None, :]).astype(param_dtype)
        segt = seg.T
        w_slab = jnp.tile(weight, k).reshape(1, Cp)
        b_slab = jnp.tile(bias, k).reshape(1, Cp)
    else:
        param_dtype = jnp.float32
        w_slab = weight.reshape(1, Cp)
        b_slab = bias.reshape(1, Cp)

    # Per-row VMEM footprint: double-buffered in+out tiles (4x) plus ~3 f32
    # temporaries (x_f32, x*x, y) materialized inside the kernel.
    bytes_per_row = 4 * Cp * itemsize + 12 * Cp
    budget_rows = max(sub, tile_budget // bytes_per_row)
    if num_tc > 1 and Rp > 2 * num_tc * sub:
        # Only multi-TC chips benefit from forcing multiple grid steps.
        budget_rows = min(budget_rows, _round_up(pl.cdiv(Rp, 2 * num_tc), sub))
    if budget_rows >= Rp:
        block_rows = Rp                      # full dim: always layout-legal
    else:
        block_rows = max(sub, (budget_rows // sub) * sub)
    grid = (pl.cdiv(Rp, block_rows),)

    const_bytes = 4 * Cp * 8
    if k > 1:
        const_bytes += 4 * Cp * k * jnp.dtype(param_dtype).itemsize
    working_bytes = block_rows * bytes_per_row + const_bytes

    cost = pl.CostEstimate(
        flops=(10 + 8 * k) * R_pad * C,
        transcendentals=R_pad,
        bytes_accessed=2 * R_pad * C * itemsize + 2 * C * itemsize,
    )

    data_spec = pl.BlockSpec((block_rows, Cp), lambda i: (i, 0))
    vec_spec = pl.BlockSpec((1, Cp), lambda i: (0, 0))

    if k > 1:
        kernel = functools.partial(_ln_lastdim_packed_kernel, eps=float(eps), inv_c=1.0 / C)
        in_specs = [data_spec, vec_spec, vec_spec,
                    pl.BlockSpec((Cp, k), lambda i: (0, 0)),
                    pl.BlockSpec((k, Cp), lambda i: (0, 0))]
        args = (x_slab, w_slab, b_slab, seg, segt)
    else:
        kernel = functools.partial(_ln_rows_kernel, eps=float(eps), inv_c=1.0 / C)
        in_specs = [data_spec, vec_spec, vec_spec]
        args = (x_slab, w_slab, b_slab)

    out = pl.pallas_call(
        kernel,
        out_shape=jax.ShapeDtypeStruct((Rp, Cp), dtype),
        grid_spec=pltpu.PrefetchScalarGridSpec(
            num_scalar_prefetch=0,
            grid=grid,
            in_specs=in_specs,
            out_specs=pl.BlockSpec((block_rows, Cp), lambda i: (i, 0)),
        ),
        compiler_params=pltpu.CompilerParams(
            dimension_semantics=("parallel",),
            vmem_limit_bytes=_vmem_limit(working_bytes, vmem_cap),
        ),
        cost_estimate=cost,
    )(*args)

    y = out.reshape(R_pad, C)
    return y if R_pad == R else y[:R]


# --------------------------------------------------------------------------
# channels_first: normalize over the channel (sublane) axis of native
# (B, C, H*W) tiles — no HBM transposes, spatial on lanes.
# --------------------------------------------------------------------------
def _ln_channels_first_kernel(x_ref, w_ref, b_ref, o_ref, *, eps, inv_c):
    x = x_ref[...].astype(jnp.float32)              # (bb, C, st)
    s1 = jnp.sum(x, axis=1, keepdims=True)          # (bb, 1, st)
    s2 = jnp.sum(x * x, axis=1, keepdims=True)
    mu = s1 * inv_c
    var = s2 * inv_c - mu * mu
    inv = jax.lax.rsqrt(var + eps)
    w = w_ref[...].astype(jnp.float32)[None]        # (1, C, 1)
    b = b_ref[...].astype(jnp.float32)[None]
    o_ref[...] = ((x - mu) * inv * w + b).astype(o_ref.dtype)


def _layer_norm_channels_first(x, weight, bias, eps):
    B, C, H, W = x.shape
    dtype = x.dtype
    itemsize = jnp.dtype(dtype).itemsize
    HW = H * W
    tile_budget, vmem_cap, num_tc = _chip_config()
    x3d = x.reshape(B, C, HW)

    # Per-element VMEM footprint: double-buffered in+out tiles + ~3 f32 temps.
    bpe = 4 * itemsize + 12
    image_bytes = C * HW * bpe
    max_lanes_by_budget = max(128, (tile_budget // max(1, C * bpe)) // 128 * 128)

    if num_tc > 1 and B == 1 and HW > 2 * 128:
        # Single image on a multi-TensorCore chip: split spatially so each
        # core gets at least one grid step.
        bb = 1
        st = min(max_lanes_by_budget,
                 max(128, _round_up(pl.cdiv(HW, 2 * num_tc), 128)))
    elif image_bytes <= tile_budget:
        # Whole images fit: span several batch elements per block to amortize
        # the per-grid-step fixed cost (ConvNeXt late stages have tiny HW).
        st = HW
        bb = max(1, min(B, tile_budget // max(1, image_bytes)))
        if num_tc > 1:
            bb = min(bb, max(1, B // (2 * num_tc)))
    else:
        bb = 1
        st = max_lanes_by_budget
    st = min(st, HW)
    grid = (pl.cdiv(B, bb), pl.cdiv(HW, st))

    working_bytes = bb * C * st * bpe + 4 * C * 8
    cost = pl.CostEstimate(
        flops=10 * B * C * HW,
        transcendentals=B * HW,
        bytes_accessed=2 * B * C * HW * itemsize + 2 * C * itemsize,
    )
    kernel = functools.partial(_ln_channels_first_kernel, eps=float(eps), inv_c=1.0 / C)

    y3d = pl.pallas_call(
        kernel,
        out_shape=jax.ShapeDtypeStruct((B, C, HW), dtype),
        grid_spec=pltpu.PrefetchScalarGridSpec(
            num_scalar_prefetch=0,
            grid=grid,
            in_specs=[
                pl.BlockSpec((bb, C, st), lambda b, s: (b, 0, s)),
                pl.BlockSpec((C, 1), lambda b, s: (0, 0)),
                pl.BlockSpec((C, 1), lambda b, s: (0, 0)),
            ],
            out_specs=pl.BlockSpec((bb, C, st), lambda b, s: (b, 0, s)),
        ),
        compiler_params=pltpu.CompilerParams(
            dimension_semantics=("parallel", "parallel"),
            vmem_limit_bytes=_vmem_limit(working_bytes, vmem_cap),
        ),
        cost_estimate=cost,
    )(x3d, weight.reshape(C, 1), bias.reshape(C, 1))
    return y3d.reshape(B, C, H, W)


# --------------------------------------------------------------------------
# Public functional equivalent of the PyTorch module's forward.
# --------------------------------------------------------------------------
def layer_norm(x, weight, bias, eps=1e-6, data_format="channels_last"):
    if data_format not in ("channels_last", "channels_first"):
        raise NotImplementedError
    C = weight.shape[0]
    if data_format == "channels_last":
        assert x.shape[-1] == C
        lead = x.shape[:-1]
        y2d = _layer_norm_lastdim(x.reshape(-1, C), weight, bias, eps)
        return y2d.reshape(*lead, C)
    else:
        assert x.shape[1] == C
        return _layer_norm_channels_first(x, weight, bias, eps)


def _reference_layer_norm(x, weight, bias, eps, data_format):
    x = x.astype(jnp.float32)
    if data_format == "channels_last":
        mu = jnp.mean(x, axis=-1, keepdims=True)
        var = jnp.mean((x - mu) ** 2, axis=-1, keepdims=True)
        return (x - mu) / jnp.sqrt(var + eps) * weight + bias
    else:
        mu = jnp.mean(x, axis=1, keepdims=True)
        var = jnp.mean((x - mu) ** 2, axis=1, keepdims=True)
        xn = (x - mu) / jnp.sqrt(var + eps)
        return weight[None, :, None, None] * xn + bias[None, :, None, None]


if __name__ == "__main__":
    key = jax.random.PRNGKey(0)
    k1, k2, k3, k4, k5, k6, k7, k8 = jax.random.split(key, 8)
    eps = 1e-6
    C = 32

    weight = jnp.ones((C,), jnp.float32) + 0.01 * jax.random.normal(k3, (C,), jnp.float32)
    bias = jnp.zeros((C,), jnp.float32) + 0.01 * jax.random.normal(k4, (C,), jnp.float32)

    # channels_first: NCHW input, sublane reduction, multi-image blocks.
    x_cf = jax.random.normal(k1, (2, C, 16, 16), jnp.float32)
    y_cf = jax.block_until_ready(layer_norm(x_cf, weight, bias, eps, "channels_first"))
    ref_cf = _reference_layer_norm(x_cf, weight, bias, eps, "channels_first")
    assert y_cf.shape == x_cf.shape
    assert jnp.allclose(y_cf, ref_cf, atol=2e-5, rtol=2e-5), float(jnp.max(jnp.abs(y_cf - ref_cf)))

    # channels_last, lane-packed path (C=32 -> 4 logical rows per 128-lane slab row).
    x_cl = jax.random.normal(k2, (2, 8, 8, C), jnp.float32)
    y_cl = jax.block_until_ready(layer_norm(x_cl, weight, bias, eps, "channels_last"))
    ref_cl = _reference_layer_norm(x_cl, weight, bias, eps, "channels_last")
    assert y_cl.shape == x_cl.shape
    assert jnp.allclose(y_cl, ref_cl, atol=2e-5, rtol=2e-5), float(jnp.max(jnp.abs(y_cl - ref_cl)))

    # channels_last, lane-packed with row padding (R=75 -> padded to 76, no masked fallback).
    x_odd = jax.random.normal(k5, (3, 5, 5, C), jnp.float32)
    y_odd = jax.block_until_ready(layer_norm(x_odd, weight, bias, eps, "channels_last"))
    ref_odd = _reference_layer_norm(x_odd, weight, bias, eps, "channels_last")
    assert y_odd.shape == x_odd.shape
    assert jnp.allclose(y_odd, ref_odd, atol=2e-5, rtol=2e-5), float(jnp.max(jnp.abs(y_odd - ref_odd)))

    # channels_last, bf16 input (bf16 seg matrices / un-upcast MXU LHS).
    x_bf = jax.random.normal(k6, (2, 8, 8, C), jnp.float32).astype(jnp.bfloat16)
    y_bf = jax.block_until_ready(layer_norm(x_bf, weight, bias, eps, "channels_last"))
    ref_bf = _reference_layer_norm(x_bf, weight, bias, eps, "channels_last")
    assert y_bf.shape == x_bf.shape
    assert jnp.allclose(y_bf.astype(jnp.float32), ref_bf, atol=3e-2, rtol=3e-2), \
        float(jnp.max(jnp.abs(y_bf.astype(jnp.float32) - ref_bf)))

    # channels_last, k == 1 path (C already a multiple of 128).
    C2 = 128
    w2 = jnp.ones((C2,), jnp.float32) + 0.01 * jax.random.normal(k7, (C2,), jnp.float32)
    b2 = 0.01 * jax.random.normal(k8, (C2,), jnp.float32)
    x_k1 = jax.random.normal(k7, (2, 4, 4, C2), jnp.float32)
    y_k1 = jax.block_until_ready(layer_norm(x_k1, w2, b2, eps, "channels_last"))
    ref_k1 = _reference_layer_norm(x_k1, w2, b2, eps, "channels_last")
    assert y_k1.shape == x_k1.shape
    assert jnp.allclose(y_k1, ref_k1, atol=2e-5, rtol=2e-5), float(jnp.max(jnp.abs(y_k1 - ref_k1)))

    print("KERNEL_OK")
</pallas_src>

<mosaic_0001>
module attributes {stable_mosaic.version = 11 : i64} {
  func.func @_ln_channels_first_kernel(%arg0: i32, %arg1: i32, %arg2: memref<2x32x256xf32, #tpu.memory_space<vmem>>, %arg3: memref<32x1xf32, #tpu.memory_space<vmem>>, %arg4: memref<32x1xf32, #tpu.memory_space<vmem>>, %arg5: memref<2x32x256xf32, #tpu.memory_space<vmem>>) attributes {dimension_semantics = [#tpu.dimension_semantics<parallel>, #tpu.dimension_semantics<parallel>], iteration_bounds = array<i64: 1, 1>, scalar_prefetch = 0 : i64, scratch_operands = 0 : i64, tpu.core_type = #tpu.core_type<tc>, window_params = [{transform_indices = @transform_0, window_bounds = array<i64: 2, 32, 256>}, {pipeline_mode = #tpu.pipeline_mode<synchronous>, transform_indices = @transform_1, window_bounds = array<i64: 32, 1>}, {pipeline_mode = #tpu.pipeline_mode<synchronous>, transform_indices = @transform_2, window_bounds = array<i64: 32, 1>}, {transform_indices = @transform_3, window_bounds = array<i64: 2, 32, 256>}]} {
    %c0 = arith.constant 0 : index
    %c0_0 = arith.constant 0 : index
    %c0_1 = arith.constant 0 : index
    %0 = vector.load %arg2[%c0, %c0_0, %c0_1] : memref<2x32x256xf32, #tpu.memory_space<vmem>>, vector<2x32x256xf32>
    %cst = arith.constant dense<0.000000e+00> : vector<2x256xf32>
    %1 = vector.multi_reduction <add>, %0, %cst [1] : vector<2x32x256xf32> to vector<2x256xf32>
    %2 = vector.shape_cast %1 : vector<2x256xf32> to vector<2x1x256xf32>
    %3 = arith.mulf %0, %0 : vector<2x32x256xf32>
    %cst_2 = arith.constant dense<0.000000e+00> : vector<2x256xf32>
    %4 = vector.multi_reduction <add>, %3, %cst_2 [1] : vector<2x32x256xf32> to vector<2x256xf32>
    %5 = vector.shape_cast %4 : vector<2x256xf32> to vector<2x1x256xf32>
    %cst_3 = arith.constant 3.125000e-02 : f32
    %6 = vector.broadcast %cst_3 : f32 to vector<2x1x256xf32>
    %7 = arith.mulf %2, %6 : vector<2x1x256xf32>
    %cst_4 = arith.constant 3.125000e-02 : f32
    %8 = vector.broadcast %cst_4 : f32 to vector<2x1x256xf32>
    %9 = arith.mulf %5, %8 : vector<2x1x256xf32>
    %10 = arith.mulf %7, %7 : vector<2x1x256xf32>
    %11 = arith.subf %9, %10 : vector<2x1x256xf32>
    %cst_5 = arith.constant 9.99999997E-7 : f32
    %12 = vector.broadcast %cst_5 : f32 to vector<2x1x256xf32>
    %13 = arith.addf %11, %12 : vector<2x1x256xf32>
    %14 = math.rsqrt %13 : vector<2x1x256xf32>
    %c0_6 = arith.constant 0 : index
    %c0_7 = arith.constant 0 : index
    %15 = vector.load %arg3[%c0_6, %c0_7] : memref<32x1xf32, #tpu.memory_space<vmem>>, vector<32x1xf32>
    %16 = vector.shape_cast %15 : vector<32x1xf32> to vector<1x32x1xf32>
    %c0_8 = arith.constant 0 : index
    %c0_9 = arith.constant 0 : index
    %17 = vector.load %arg4[%c0_8, %c0_9] : memref<32x1xf32, #tpu.memory_space<vmem>>, vector<32x1xf32>
    %18 = vector.shape_cast %17 : vector<32x1xf32> to vector<1x32x1xf32>
    %19 = vector.broadcast %7 : vector<2x1x256xf32> to vector<2x32x256xf32>
    %20 = arith.subf %0, %19 : vector<2x32x256xf32>
    %21 = vector.broadcast %14 : vector<2x1x256xf32> to vector<2x32x256xf32>
    %22 = arith.mulf %20, %21 : vector<2x32x256xf32>
    %23 = vector.broadcast %16 : vector<1x32x1xf32> to vector<2x32x256xf32>
    %24 = arith.mulf %22, %23 : vector<2x32x256xf32>
    %25 = vector.broadcast %18 : vector<1x32x1xf32> to vector<2x32x256xf32>
    %26 = arith.addf %24, %25 : vector<2x32x256xf32>
    %c0_10 = arith.constant 0 : index
    %c0_11 = arith.constant 0 : index
    %c0_12 = arith.constant 0 : index
    %27 = vector.load %arg5[%c0_10, %c0_11, %c0_12] : memref<2x32x256xf32, #tpu.memory_space<vmem>>, vector<2x32x256xf32>
    tpu.vector_store %arg5[%c0_10, %c0_11, %c0_12], %26 {strides = array<i32>} : memref<2x32x256xf32, #tpu.memory_space<vmem>>, vector<2x32x256xf32>,
    return
  }
  func.func @transform_0(%arg0: i32, %arg1: i32) -> (i32, i32, i32) {
    %c0_i32 = arith.constant 0 : i32
    %c0_i32_0 = arith.constant 0 : i32
    return %arg0, %c0_i32, %arg1 : i32, i32, i32
  }
  func.func @transform_1(%arg0: i32, %arg1: i32) -> (i32, i32) {
    %c0_i32 = arith.constant 0 : i32
    %c0_i32_0 = arith.constant 0 : i32
    %c0_i32_1 = arith.constant 0 : i32
    return %c0_i32, %c0_i32_0 : i32, i32
  }
  func.func @transform_2(%arg0: i32, %arg1: i32) -> (i32, i32) {
    %c0_i32 = arith.constant 0 : i32
    %c0_i32_0 = arith.constant 0 : i32
    %c0_i32_1 = arith.constant 0 : i32
    return %c0_i32, %c0_i32_0 : i32, i32
  }
  func.func @transform_3(%arg0: i32, %arg1: i32) -> (i32, i32, i32) {
    %c0_i32 = arith.constant 0 : i32
    %c0_i32_0 = arith.constant 0 : i32
    return %arg0, %c0_i32, %arg1 : i32, i32, i32
  }
}

</mosaic_0001>

<bundles_post_ra>
// kernel: tpu_custom_call.1
= control target key start
LH: loop header
LB: loop body
LE: loop exit
PB: predicated region body
PF: predicated region fallthrough
CT: control target
= control target key end

     0   :  { %8 = vsyncpa [#allocation3], 0  ;;  %s524_s0 = inlined_call_operand.hbm [shape: f32[2,32,256], index: 0, kind: input, shape index: {}]   ;;  %s525_s1 = inlined_call_operand.vmem [shape: f32[32,1], index: 1, kind: input, shape index: {}]   ;;  %s526_s2 = inlined_call_operand.vmem [shape: f32[32,1], index: 2, kind: input, shape index: {}]   ;;  %s527_s3 = inlined_call_operand.hbm [shape: f32[2,32,256], index: 3, kind: output, shape index: {}]  }
   0x1   :  { %9 = vsyncpa [#allocation4], 0  ;;  %s361_s12 = smov [#allocation2]  }
   0x2   :  { %s15_s13 = sshll.u32 %s361_s12, 4  ;;  %s16_s13 = int_to_ptr.vmem [resolvable:$true] %s15_s13 }
   0x3   :  { %s325_s14 = scalar_lea.vmem %s16_s13, 2048  ;;  %p330_p1 = scmp.lt.s32.totalorder %s16_s13, %s16_s13 }
   0x4   :  { %p326_p0 = scmp.ne.s32.totalorder %s16_s13, %s325_s14  ;;  %p331_p2 = scmp.lt.s32.totalorder %s325_s14, %s325_s14 }
   0x6   :  { %p332_p3 = por %p331_p2, %p330_p1 }
   0x8   :  { %p333_p4 = pnand %p332_p3, %p326_p0 }
   0xa   :  { %336 = shalt.err (!%p333_p4)
}
   0xb   :  { %s362_s15 = smov 256   ;;  %s363_s16 = smov 16  }
   0xc   :  { %21 = dma.hbm_to_vmem [thread:$0]  %s524_s0, 2048, %s16_s13, [#allocation3], %s362_s15, %s362_s15, %s363_s16  }
   0xd   :  { %357 = dma.done.wait [#allocation3], 2048  }
   0xe   :  { %358 = vsyncadd [#allocation3], 4294965248  ;;  %v364_v0 = vmov 0   ;;  %v159_v1 = vld [vmem:[%s525_s1 + $0x10] sm:$0xff]  ;;  %v157_v2 = vld [vmem:[%s525_s1] sm:$0xff] }
   0xf   :  { %308 = vset.pattern.permute.xlu1 %v364_v0  ;;  %307 = vset.pattern.permute.xlu0 %v364_v0  ;;  %v160_v3 = vld [vmem:[%s525_s1 + $0x18] sm:$0xff]  ;;  %v158_v4 = vld [vmem:[%s525_s1 + $0x8] sm:$0xff]  ;;  %v161_v6 = vld [vmem:[%s526_s2] sm:$0xff]  ;;  %s365_s1 = smov [#allocation5]  }
  0x10   :  { %209 = vperm.xlu1 %308, %v159_v1   ;;  %199 = vperm.xlu0 %307, %v157_v2   ;;  %v162_v5 = vld [vmem:[%s526_s2 + $0x8] sm:$0xff]  ;;  %v164_v7 = vld [vmem:[%s526_s2 + $0x18] sm:$0xff]  ;;  %v163_v8 = vld [vmem:[%s526_s2 + $0x10] sm:$0xff]  ;;  %s290_s2 = sshll.u32 %s365_s1, 4  ;;  %s291_s2 = int_to_ptr.vmem [resolvable:$true] %s290_s2 }
  0x11   :  { %v416_v9 = vld [vmem:[#allocation2] sm:$0xff]  ;;  %v418_v10 = vld [vmem:[#allocation2 + $0x10] sm:$0xff]  ;;  %v420_v11 = vld [vmem:[#allocation2 + $0x8] sm:$0xff]  ;;  %s337_s7 = scalar_lea.vmem %s291_s2, 2048  ;;  %p342_p6 = scmp.lt.s32.totalorder %s291_s2, %s291_s2 }
  0x12   :  { %v422_v12 = vld [vmem:[#allocation2 + $0x18] sm:$0xff]  ;;  %v424_v13 = vld [vmem:[#allocation2 + $0x40] sm:$0xff]  ;;  %v426_v14 = vld [vmem:[#allocation2 + $0x50] sm:$0xff]  ;;  %v45_v17 = vadd.f32 %v418_v10, %v416_v9  ;;  %v81_v18 = vmul.f32 %v416_v9, %v416_v9  ;;  %v83_v19 = vmul.f32 %v418_v10, %v418_v10  ;;  %v82_v22 = vmul.f32 %v420_v11, %v420_v11  ;;  %p338_p5 = scmp.ne.s32.totalorder %s291_s2, %s337_s7  ;;  %p343_p7 = scmp.lt.s32.totalorder %s337_s7, %s337_s7 }
  0x13   :  { %v428_v15 = vld [vmem:[#allocation2 + $0x48] sm:$0xff]  ;;  %v430_v16 = vld [vmem:[#allocation2 + $0x58] sm:$0xff]  ;;  %v438_v20 = vld [vmem:[#allocation2 + $0x20] sm:$0xff]  ;;  %v54_v21 = vadd.f32 %v422_v12, %v420_v11  ;;  %v84_v23 = vmul.f32 %v422_v12, %v422_v12  ;;  %v63_v25 = vadd.f32 %v426_v14, %v424_v13  ;;  %v89_v26 = vmul.f32 %v424_v13, %v424_v13 }
  0x14   :  { %214 = vperm.xlu1 %308, %v160_v3   ;;  %204 = vperm.xlu0 %307, %v158_v4   ;;  %v446_v24 = vld [vmem:[#allocation2 + $0x28] sm:$0xff]  ;;  %v91_v27 = vmul.f32 %v426_v14, %v426_v14  ;;  %v454_v28 = vld [vmem:[#allocation2 + $0x60] sm:$0xff]  ;;  %v72_v29 = vadd.f32 %v430_v16, %v428_v15  ;;  %v90_v30 = vmul.f32 %v428_v15, %v428_v15  ;;  %v467_v36 = vld [vmem:[#allocation2 + $0x30] sm:$0xff]  ;;  %p344_p8 = por %p343_p7, %p342_p6 }
  0x15   :  { %v92_v31 = vmul.f32 %v430_v16, %v430_v16  ;;  %v462_v32 = vld [vmem:[#allocation2 + $0x68] sm:$0xff]  ;;  %v46_v33 = vadd.f32 %v45_v17, %v438_v20  ;;  %v85_v34 = vmul.f32 %v438_v20, %v438_v20  ;;  %v97_v35 = vadd.f32 %v83_v19, %v81_v18  ;;  %v472_v40 = vld [vmem:[#allocation2 + $0x38] sm:$0xff]  ;;  %v477_v44 = vld [vmem:[#allocation2 + $0x70] sm:$0xff] }
  0x16   :  { %v55_v37 = vadd.f32 %v54_v21, %v446_v24  ;;  %v86_v38 = vmul.f32 %v446_v24, %v446_v24  ;;  %v106_v39 = vadd.f32 %v84_v23, %v82_v22  ;;  %v64_v41 = vadd.f32 %v63_v25, %v454_v28  ;;  %v482_v48 = vld [vmem:[#allocation2 + $0x78] sm:$0xff]  ;;  %p345_p9 = pnand %p344_p8, %p338_p5 }
  0x17   :  { %v93_v42 = vmul.f32 %v454_v28, %v454_v28  ;;  %v115_v43 = vadd.f32 %v91_v27, %v89_v26  ;;  %v73_v45 = vadd.f32 %v72_v29, %v462_v32  ;;  %v94_v46 = vmul.f32 %v462_v32, %v462_v32 }
  0x18   :  { %240 = vperm.xlu1 %308, %v162_v5   ;;  %235 = vperm.xlu0 %307, %v161_v6   ;;  %v124_v47 = vadd.f32 %v92_v31, %v90_v30  ;;  %v47_v49 = vadd.f32 %v46_v33, %v467_v36  ;;  %v87_v50 = vmul.f32 %v467_v36, %v467_v36 }
  0x19   :  { %v98_v51 = vadd.f32 %v97_v35, %v85_v34  ;;  %v56_v52 = vadd.f32 %v55_v37, %v472_v40  ;;  %v88_v53 = vmul.f32 %v472_v40, %v472_v40  ;;  %v107_v54 = vadd.f32 %v106_v39, %v86_v38 }
  0x1a   :  { %v65_v55 = vadd.f32 %v64_v41, %v477_v44  ;;  %v95_v56 = vmul.f32 %v477_v44, %v477_v44  ;;  %v116_v57 = vadd.f32 %v115_v43, %v93_v42  ;;  %v74_v58 = vadd.f32 %v73_v45, %v482_v48 }
  0x1b   :  { %v96_v59 = vmul.f32 %v482_v48, %v482_v48  ;;  %v125_v60 = vadd.f32 %v124_v47, %v94_v46  ;;  %v48_v61 = vrot.slane %v47_v49, 4  ;;  %v99_v62 = vadd.f32 %v98_v51, %v87_v50 }
  0x1c   :  { %250 = vperm.xlu1 %308, %v164_v7   ;;  %245 = vperm.xlu0 %307, %v163_v8   ;;  %v57_v63 = vrot.slane %v56_v52, 4  ;;  %v108_v0 = vadd.f32 %v107_v54, %v88_v53  ;;  %v66_v1 = vrot.slane %v65_v55, 4  ;;  %v117_v2 = vadd.f32 %v116_v57, %v95_v56 }
  0x1d   :  { %v75_v3 = vrot.slane %v74_v58, 4  ;;  %v126_v4 = vadd.f32 %v125_v60, %v96_v59  ;;  %v49_v5 = vadd.f32 %v48_v61, %v47_v49  ;;  %v100_v6 = vrot.slane %v99_v62, 4 }
  0x1e   :  { %v58_v7 = vadd.f32 %v57_v63, %v56_v52  ;;  %v109_v8 = vrot.slane %v108_v0, 4  ;;  %v67_v17 = vadd.f32 %v66_v1, %v65_v55  ;;  %v118_v18 = vrot.slane %v117_v2, 4 }
  0x1f   :  { %v76_v19 = vadd.f32 %v75_v3, %v74_v58  ;;  %v127_v21 = vrot.slane %v126_v4, 4  ;;  %v50_v22 = vrot.slane %v49_v5, 2  ;;  %v101_v23 = vadd.f32 %v100_v6, %v99_v62 }
  0x20   :  { %v59_v25 = vrot.slane %v58_v7, 2  ;;  %v110_v26 = vadd.f32 %v109_v8, %v108_v0  ;;  %v68_v27 = vrot.slane %v67_v17, 2  ;;  %v119_v29 = vadd.f32 %v118_v18, %v117_v2 }
  0x21   :  { %v77_v30 = vrot.slane %v76_v19, 2  ;;  %v128_v31 = vadd.f32 %v127_v21, %v126_v4  ;;  %v51_v33 = vadd.f32 %v50_v22, %v49_v5  ;;  %v102_v34 = vrot.slane %v101_v23, 2 }
  0x22   :  { %v60_v35 = vadd.f32 %v59_v25, %v58_v7  ;;  %v111_v37 = vrot.slane %v110_v26, 2  ;;  %v69_v38 = vadd.f32 %v68_v27, %v67_v17  ;;  %v120_v39 = vrot.slane %v119_v29, 2 }
  0x23   :  { %v78_v41 = vadd.f32 %v77_v30, %v76_v19  ;;  %v129_v42 = vrot.slane %v128_v31, 2  ;;  %v52_v43 = vrot.slane %v51_v33, 1  ;;  %v103_v45 = vadd.f32 %v102_v34, %v101_v23 }
  0x24   :  { %v61_v46 = vrot.slane %v60_v35, 1  ;;  %v112_v47 = vadd.f32 %v111_v37, %v110_v26  ;;  %v70_v49 = vrot.slane %v69_v38, 1  ;;  %v121_v50 = vadd.f32 %v120_v39, %v119_v29 }
  0x25   :  { %v79_v51 = vrot.slane %v78_v41, 1  ;;  %v130_v52 = vadd.f32 %v129_v42, %v128_v31  ;;  %v53_v53 = vadd.f32 %v52_v43, %v51_v33  ;;  %v104_v54 = vrot.slane %v103_v45, 1 }
  0x26   :  { %v62_v55 = vadd.f32 %v61_v46, %v60_v35  ;;  %v113_v56 = vrot.slane %v112_v47, 1  ;;  %v71_v57 = vadd.f32 %v70_v49, %v69_v38  ;;  %v122_v58 = vrot.slane %v121_v50, 1 }
  0x27   :  { %v80_v59 = vadd.f32 %v79_v51, %v78_v41  ;;  %v131_v60 = vrot.slane %v130_v52, 1  ;;  %v105_v61 = vadd.f32 %v104_v54, %v103_v45  ;;  %v133_v62 = vmul.f32 0.03125, %v53_v53 }
  0x28   :  { %v114_v63 = vadd.f32 %v113_v56, %v112_v47  ;;  %v134_v0 = vmul.f32 0.03125, %v62_v55  ;;  %v123_v1 = vadd.f32 %v122_v58, %v121_v50  ;;  %v135_v2 = vmul.f32 0.03125, %v71_v57 }
  0x29   :  { %v132_v3 = vadd.f32 %v131_v60, %v130_v52  ;;  %v136_v4 = vmul.f32 0.03125, %v80_v59  ;;  %v137_v5 = vmul.f32 0.03125, %v105_v61  ;;  %v141_v6 = vmul.f32 %v133_v62, %v133_v62 }
  0x2a   :  { %v138_v7 = vmul.f32 0.03125, %v114_v63  ;;  %v142_v8 = vmul.f32 %v134_v0, %v134_v0  ;;  %v139_v17 = vmul.f32 0.03125, %v123_v1  ;;  %v143_v18 = vmul.f32 %v135_v2, %v135_v2 }
  0x2b   :  { %v140_v19 = vmul.f32 0.03125, %v132_v3  ;;  %v144_v21 = vmul.f32 %v136_v4, %v136_v4  ;;  %v145_v22 = vsub.f32 %v137_v5, %v141_v6  ;;  %v167_v35 = vsub.f32 %v418_v10, %v133_v62 }
  0x2c   :  { %v146_v23 = vsub.f32 %v138_v7, %v142_v8  ;;  %v147_v25 = vsub.f32 %v139_v17, %v143_v18  ;;  %v168_v37 = vsub.f32 %v422_v12, %v134_v0  ;;  %v175_v38 = vsub.f32 %v426_v14, %v135_v2 }
  0x2d   :  { %v148_v26 = vsub.f32 %v140_v19, %v144_v21  ;;  %v149_v27 = vadd.f32 1e-06, %v145_v22  ;;  %v176_v39 = vsub.f32 %v430_v16, %v136_v4  ;;  %v165_v45 = vsub.f32 %v416_v9, %v133_v62 }
  0x2e   :  { %v150_v29 = vadd.f32 1e-06, %v146_v23  ;;  %v151_v30 = vadd.f32 1e-06, %v147_v25  ;;  %v166_v46 = vsub.f32 %v420_v11, %v134_v0  ;;  %v173_v47 = vsub.f32 %v424_v13, %v135_v2 }
  0x2f   :  { %v152_v31 = vadd.f32 1e-06, %v148_v26  ;;  %309 = vrsqrt.f32 %v149_v27  ;;  %v174_v49 = vsub.f32 %v428_v15, %v136_v4  ;;  %v171_v10 = vsub.f32 %v467_v36, %v133_v62 }
  0x30   :  { %311 = vrsqrt.f32 %v150_v29  ;;  %v172_v12 = vsub.f32 %v472_v40, %v134_v0  ;;  %v169_v14 = vsub.f32 %v438_v20, %v133_v62  ;;  %v170_v16 = vsub.f32 %v446_v24, %v134_v0 }
  0x31   :  { %313 = vrsqrt.f32 %v151_v30  ;;  %v179_v51 = vsub.f32 %v477_v44, %v135_v2  ;;  %v180_v52 = vsub.f32 %v482_v48, %v136_v4  ;;  %v177_v9 = vsub.f32 %v454_v28, %v135_v2 }
  0x32   :  { %315 = vrsqrt.f32 %v152_v31  ;;  %v178_v11 = vsub.f32 %v462_v32, %v136_v4 }
  0x3c   :  { %v310_v33 = vpop.eup %309 }
  0x3d   :  { %v312_v34 = vpop.eup %311  ;;  %v183_v13 = vmul.f32 %v310_v33, %v167_v35  ;;  %v181_v55 = vmul.f32 %v310_v33, %v165_v45  ;;  %v187_v58 = vmul.f32 %v310_v33, %v171_v10  ;;  %v185_v59 = vmul.f32 %v310_v33, %v169_v14 }
  0x3e   :  { %v314_v41 = vpop.eup %313  ;;  %v184_v53 = vmul.f32 %v312_v34, %v168_v37  ;;  %v182_v36 = vmul.f32 %v312_v34, %v166_v46  ;;  %v188_v24 = vmul.f32 %v312_v34, %v172_v12  ;;  %v186_v44 = vmul.f32 %v312_v34, %v170_v16 }
  0x3f   :  { %v316_v50 = vpop.eup %315  ;;  %v191_v15 = vmul.f32 %v314_v41, %v175_v38  ;;  %v189_v56 = vmul.f32 %v314_v41, %v173_v47  ;;  %v195_v60 = vmul.f32 %v314_v41, %v179_v51  ;;  %v193_v61 = vmul.f32 %v314_v41, %v177_v9 }
  0x40   :  { %v192_v54 = vmul.f32 %v316_v50, %v176_v39  ;;  %v190_v40 = vmul.f32 %v316_v50, %v174_v49  ;;  %v196_v48 = vmul.f32 %v316_v50, %v180_v52  ;;  %v194_v28 = vmul.f32 %v316_v50, %v178_v11 }
  0x8b   :  { %v500_v42 = vpop.permute.xlu1 %209  ;;  %v200_v43 = vpop.permute.xlu0 %199 }
  0x8c   :  { %v217_v1 = vmul.f32 %v200_v43, %v181_v55  ;;  %v218_v2 = vmul.f32 %v200_v43, %v182_v36  ;;  %v225_v3 = vmul.f32 %v200_v43, %v189_v56  ;;  %v226_v4 = vmul.f32 %v200_v43, %v190_v40 }
  0x8d   :  { %v221_v33 = vmul.f32 %v500_v42, %v185_v59  ;;  %v222_v34 = vmul.f32 %v500_v42, %v186_v44  ;;  %v229_v35 = vmul.f32 %v500_v42, %v193_v61  ;;  %v230_v37 = vmul.f32 %v500_v42, %v194_v28 }
  0x8f   :  { %v215_v57 = vpop.permute.xlu1 %214  ;;  %v205_v20 = vpop.permute.xlu0 %204 }
  0x90   :  { %v219_v62 = vmul.f32 %v205_v20, %v183_v13  ;;  %v220_v32 = vmul.f32 %v205_v20, %v184_v53  ;;  %v227_v63 = vmul.f32 %v205_v20, %v191_v15  ;;  %v228_v0 = vmul.f32 %v205_v20, %v192_v54 }
  0x91   :  { %v223_v25 = vmul.f32 %v215_v57, %v187_v58  ;;  %v224_v26 = vmul.f32 %v215_v57, %v188_v24  ;;  %v231_v27 = vmul.f32 %v215_v57, %v195_v60  ;;  %v232_v29 = vmul.f32 %v215_v57, %v196_v48 }
  0x93   :  { %v241_v5 = vpop.permute.xlu1 %240  ;;  %v236_v6 = vpop.permute.xlu0 %235 }
  0x94   :  { %v255_v7 = vadd.f32 %v241_v5, %v219_v62  ;;  %v256_v8 = vadd.f32 %v241_v5, %v220_v32  ;;  %v263_v17 = vadd.f32 %v241_v5, %v227_v63  ;;  %v264_v18 = vadd.f32 %v241_v5, %v228_v0 }
  0x95   :  { %v253_v19 = vadd.f32 %v236_v6, %v217_v1  ;;  %v254_v21 = vadd.f32 %v236_v6, %v218_v2  ;;  %v261_v22 = vadd.f32 %v236_v6, %v225_v3  ;;  %v262_v23 = vadd.f32 %v236_v6, %v226_v4 }
  0x96   :  { %271 = vst [vmem:[#allocation5 + $0x10] sm:$0xff] %v255_v7  ;;  %272 = vst [vmem:[#allocation5 + $0x18] sm:$0xff] %v256_v8 }
  0x97   :  { %279 = vst [vmem:[#allocation5 + $0x50] sm:$0xff] %v263_v17  ;;  %280 = vst [vmem:[#allocation5 + $0x58] sm:$0xff] %v264_v18  ;;  %v251_v30 = vpop.permute.xlu1 %250  ;;  %v246_v31 = vpop.permute.xlu0 %245 }
  0x98   :  { %269 = vst [vmem:[#allocation5] sm:$0xff] %v253_v19  ;;  %270 = vst [vmem:[#allocation5 + $0x8] sm:$0xff] %v254_v21  ;;  %v259_v38 = vadd.f32 %v251_v30, %v223_v25  ;;  %v260_v39 = vadd.f32 %v251_v30, %v224_v26  ;;  %v267_v41 = vadd.f32 %v251_v30, %v231_v27 }
  0x99   :  { %277 = vst [vmem:[#allocation5 + $0x40] sm:$0xff] %v261_v22  ;;  %278 = vst [vmem:[#allocation5 + $0x48] sm:$0xff] %v262_v23  ;;  %v268_v43 = vadd.f32 %v251_v30, %v232_v29  ;;  %v257_v45 = vadd.f32 %v246_v31, %v221_v33  ;;  %v258_v46 = vadd.f32 %v246_v31, %v222_v34 }
  0x9a   :  { %v265_v47 = vadd.f32 %v246_v31, %v229_v35  ;;  %v266_v49 = vadd.f32 %v246_v31, %v230_v37  ;;  %275 = vst [vmem:[#allocation5 + $0x30] sm:$0xff] %v259_v38  ;;  %276 = vst [vmem:[#allocation5 + $0x38] sm:$0xff] %v260_v39 }
  0x9b   :  { %283 = vst [vmem:[#allocation5 + $0x70] sm:$0xff] %v267_v41  ;;  %284 = vst [vmem:[#allocation5 + $0x78] sm:$0xff] %v268_v43 }
  0x9c   :  { %273 = vst [vmem:[#allocation5 + $0x20] sm:$0xff] %v257_v45  ;;  %274 = vst [vmem:[#allocation5 + $0x28] sm:$0xff] %v258_v46 }
  0x9d   :  { %281 = vst [vmem:[#allocation5 + $0x60] sm:$0xff] %v265_v47  ;;  %282 = vst [vmem:[#allocation5 + $0x68] sm:$0xff] %v266_v49 }
  0x9e   :  { %348 = shalt.err (!%p345_p9)
}
  0x9f   :  { %296 = dma.vmem_to_hbm [thread:$0]  %s291_s2, 2048, %s527_s3, [#allocation4], %s362_s15, %s362_s15, %s363_s16  }
  0xa0   :  { %359 = dma.done.wait [#allocation4], 2048  }
  0xa1   :  { %360 = vsyncadd [#allocation4], 4294965248 }
  0xa2   :  { %300 = vsyncpa [#allocation3], 1 }
  0xa3   :  { %301 = vsyncpa [#allocation4], 1 }

</bundles_post_ra>
